<compile_context>
chip_gen: v5e
topology: v5e:2x2
jax: 0.10.0
libtpu: 0.0.40
codegen_flags: <defaults>
</compile_context>

<pallas_src>
import functools

import jax
import jax.numpy as jnp
from jax.experimental import pallas as pl
from jax.experimental.pallas import tpu as pltpu


def _r2_partial_kernel(total_rows, block_rows, lanes, tiles_per_core,
                       total_tiles, yp_ref, yt_ref, out_ref,
                       sy_ref, syy_ref, srr_ref):
    """Per-core partial sums for the R2 loss.

    Scratch (VMEM, each (8, lanes) f32):
      sy_ref  : running per-lane-slot sum of y_true
      syy_ref : running per-lane-slot sum of y_true^2
      srr_ref : running per-lane-slot sum of (y_true - y_pred)^2
    Output block (1, 8, 128): lanes 0/1/2 of sublane 0 hold the three scalars.
    """
    c = pl.program_id(0)            # TensorCore index ("parallel" axis)
    t = pl.program_id(1)            # tile index within this core ("arbitrary")
    gt = c * tiles_per_core + t     # global tile index

    @pl.when(t == 0)
    def _init():
        sy_ref[...] = jnp.zeros_like(sy_ref)
        syy_ref[...] = jnp.zeros_like(syy_ref)
        srr_ref[...] = jnp.zeros_like(srr_ref)

    sub = block_rows // 8

    def accumulate(yt, yp):
        # Pure elementwise VPU work: fold the (block_rows, lanes) tile into the
        # (8, lanes) accumulators (vreg adds only; no reduce-to-scalar here).
        diff = yt - yp
        sy_ref[...] += jnp.sum(yt.reshape(sub, 8, lanes), axis=0)
        syy_ref[...] += jnp.sum((yt * yt).reshape(sub, 8, lanes), axis=0)
        srr_ref[...] += jnp.sum((diff * diff).reshape(sub, 8, lanes), axis=0)

    last_real = total_tiles - 1
    ragged_rows = total_rows - last_real * block_rows     # rows in last real tile
    full_last = (ragged_rows == block_rows)               # static Python bool
    no_phantom = (total_tiles == 2 * tiles_per_core)      # static Python bool

    if full_last and no_phantom:
        # Every grid step owns a full, valid tile: no masking code emitted.
        accumulate(yt_ref[...].astype(jnp.float32),
                   yp_ref[...].astype(jnp.float32))
    else:
        @pl.when(gt < last_real)
        def _full_tiles():
            accumulate(yt_ref[...].astype(jnp.float32),
                       yp_ref[...].astype(jnp.float32))

        @pl.when(gt == last_real)
        def _last_tile():
            yt = yt_ref[...].astype(jnp.float32)
            yp = yp_ref[...].astype(jnp.float32)
            if not full_last:
                rid = jax.lax.broadcasted_iota(jnp.int32, (block_rows, lanes), 0)
                valid = rid < ragged_rows
                yt = jnp.where(valid, yt, 0.0)
                yp = jnp.where(valid, yp, 0.0)
            accumulate(yt, yp)
        # gt > last_real: phantom tile (odd tile count) -> contributes nothing.

    @pl.when(t == pl.num_programs(1) - 1)
    def _finalize():
        # One cross-lane/sublane reduction per core, off the per-step path.
        s_y = jnp.sum(sy_ref[...])
        s_yy = jnp.sum(syy_ref[...])
        s_rr = jnp.sum(srr_ref[...])
        lane = jax.lax.broadcasted_iota(jnp.int32, (1, 8, 128), 2)
        out_ref[...] = jnp.where(lane == 0, s_y,
                                 jnp.where(lane == 1, s_yy,
                                           jnp.where(lane == 2, s_rr, 0.0)))


def r2_loss(y_pred, y_true, *, block_rows=None, lanes=None):
    """Pallas TPU equivalent of R2Loss.forward(y_pred, y_true) -> scalar."""
    assert y_pred.shape == y_true.shape, "y_pred / y_true shape mismatch"
    n = int(y_true.size)
    assert n > 0

    # Flatten only; dtype upcast happens per-tile in the kernel (bf16/f16
    # inputs stream at native width).
    yp = y_pred.reshape(-1)
    yt = y_true.reshape(-1)

    # Lane-dense last dim.  Only if N is not a multiple of 128 do we fall back
    # to a minimal zero pad (both tensors identically, so padded elements
    # contribute nothing; the true N is used in the finalize math).
    if lanes is None:
        for cand in (512, 256, 128):
            if n % cand == 0:
                lanes = cand
                break
        else:
            lanes = 128
    padded = -(-n // lanes) * lanes
    if padded != n:
        # TODO(synk): mask the sub-lane ragged tail in-kernel instead of this
        # (< lanes elements of) zero-pad, which still copies the tensors.
        yp = jnp.pad(yp, (0, padded - n))
        yt = jnp.pad(yt, (0, padded - n))
    rows = padded // lanes

    yp2 = yp.reshape(rows, lanes)
    yt2 = yt.reshape(rows, lanes)

    # ~2 MiB per input per grid step (double-buffered 2 inputs -> ~8 MiB VMEM).
    if block_rows is None:
        itemsize = max(jnp.dtype(y_true.dtype).itemsize,
                       jnp.dtype(y_pred.dtype).itemsize)
        target_rows = max(8, ((2 << 20) // (lanes * itemsize)) // 8 * 8)
        block_rows = min(target_rows, -(-rows // 8) * 8)
    assert block_rows % 8 == 0 and block_rows > 0

    total_tiles = -(-rows // block_rows)
    num_cores = 2                        # leading "parallel" axis -> both v7x TCs
    tiles_per_core = -(-total_tiles // num_cores)

    def tile_map(c, t):
        gt = c * tiles_per_core + t
        return (jnp.minimum(gt, total_tiles - 1), 0)   # clamp phantom tiles

    kernel = functools.partial(_r2_partial_kernel, rows, block_rows, lanes,
                               tiles_per_core, total_tiles)

    partials = pl.pallas_call(
        kernel,
        out_shape=jax.ShapeDtypeStruct((num_cores, 8, 128), jnp.float32),
        grid_spec=pltpu.PrefetchScalarGridSpec(
            num_scalar_prefetch=0,
            grid=(num_cores, tiles_per_core),
            in_specs=[
                pl.BlockSpec((block_rows, lanes), tile_map),
                pl.BlockSpec((block_rows, lanes), tile_map),
            ],
            out_specs=pl.BlockSpec((1, 8, 128), lambda c, t: (c, 0, 0)),
            scratch_shapes=[
                pltpu.VMEM((8, lanes), jnp.float32),
                pltpu.VMEM((8, lanes), jnp.float32),
                pltpu.VMEM((8, lanes), jnp.float32),
            ],
        ),
        compiler_params=pltpu.CompilerParams(
            dimension_semantics=("parallel", "arbitrary"),
            vmem_limit_bytes=32 * 1024 * 1024,
        ),
    )(yp2, yt2)

    # Combine per-core partials and finalize (a handful of scalar XLA ops).
    s = jnp.sum(partials[:, 0, :3], axis=0)
    s_y, s_yy, s_rr = s[0], s[1], s[2]
    ss_tot = s_yy - (s_y * s_y) / jnp.float32(n)
    ss_res = s_rr
    r2 = 1.0 - ss_res / (ss_tot + 1e-8)
    return -r2


def r2_loss_reference(y_pred, y_true):
    """Pure-JAX mirror of the PyTorch forward, for validation."""
    y_true = y_true.astype(jnp.float32)
    y_pred = y_pred.astype(jnp.float32)
    y_mean = jnp.mean(y_true)
    ss_tot = jnp.sum((y_true - y_mean) ** 2)
    ss_res = jnp.sum((y_true - y_pred) ** 2)
    return -(1.0 - ss_res / (ss_tot + 1e-8))


if __name__ == "__main__":
    key = jax.random.PRNGKey(0)
    k1, k2, k3, k4, k5 = jax.random.split(key, 5)

    # Case 1: small 4-D tensor (batch=2, channels=4, 16x16); single ragged tile.
    y_true = jax.random.normal(k1, (2, 4, 16, 16), jnp.float32)
    y_pred = y_true + 0.1 * jax.random.normal(k2, (2, 4, 16, 16), jnp.float32)
    out = jax.block_until_ready(r2_loss(y_pred, y_true))
    ref = r2_loss_reference(y_pred, y_true)
    assert out.shape == ()
    assert jnp.allclose(out, ref, rtol=1e-3, atol=1e-3), (out, ref)

    # Case 2: bf16 inputs, multi-tile grid with a ragged last tile and an odd
    # tile count (exercises both-core partials + phantom-tile skip + upcast).
    y_true2 = jax.random.normal(k3, (300, 256), jnp.bfloat16)
    y_pred2 = (y_true2.astype(jnp.float32)
               + 0.2 * jax.random.normal(k4, (300, 256), jnp.float32)
               ).astype(jnp.bfloat16)
    out2 = jax.block_until_ready(r2_loss(y_pred2, y_true2, block_rows=64))
    ref2 = r2_loss_reference(y_pred2, y_true2)
    assert jnp.allclose(out2, ref2, rtol=1e-2, atol=1e-2), (out2, ref2)

    # Case 3: ragged 1-D size (not a multiple of 128) -> lane-pad fallback path.
    y_true3 = jax.random.normal(k5, (1000,), jnp.float32)
    y_pred3 = y_true3 + 0.5
    out3 = jax.block_until_ready(r2_loss(y_pred3, y_true3))
    ref3 = r2_loss_reference(y_pred3, y_true3)
    assert jnp.allclose(out3, ref3, rtol=1e-3, atol=1e-3), (out3, ref3)

    print("KERNEL_OK")
</pallas_src>

<mosaic_0001>
module attributes {stable_mosaic.version = 11 : i64} {
  func.func @_r2_partial_kernel(%arg0: i32, %arg1: i32, %arg2: memref<8x512xf32, #tpu.memory_space<vmem>>, %arg3: memref<8x512xf32, #tpu.memory_space<vmem>>, %arg4: memref<1x8x128xf32, #tpu.memory_space<vmem>>, %arg5: memref<8x512xf32, #tpu.memory_space<vmem>>, %arg6: memref<8x512xf32, #tpu.memory_space<vmem>>, %arg7: memref<8x512xf32, #tpu.memory_space<vmem>>) attributes {dimension_semantics = [#tpu.dimension_semantics<parallel>, #tpu.dimension_semantics<arbitrary>], iteration_bounds = array<i64: 2, 1>, scalar_prefetch = 0 : i64, scratch_operands = 3 : i64, tpu.core_type = #tpu.core_type<tc>, window_params = [{transform_indices = @transform_0, window_bounds = array<i64: 8, 512>}, {transform_indices = @transform_1, window_bounds = array<i64: 8, 512>}, {transform_indices = @transform_2, window_bounds = array<i64: 1, 8, 128>}]} {
    %c1_i32 = arith.constant 1 : i32
    %0 = arith.muli %arg0, %c1_i32 : i32
    %1 = arith.addi %0, %arg1 : i32
    %c0_i32 = arith.constant 0 : i32
    %2 = arith.cmpi eq, %arg1, %c0_i32 : i32
    %3 = arith.extui %2 : i1 to i32
    %c0_i32_0 = arith.constant 0 : i32
    %4 = arith.cmpi ne, %3, %c0_i32_0 : i32
    scf.if %4 {
      %cst = arith.constant 0.000000e+00 : f32
      %14 = vector.broadcast %cst : f32 to vector<8x512xf32>
      %c0 = arith.constant 0 : index
      %c0_7 = arith.constant 0 : index
      %15 = vector.load %arg5[%c0, %c0_7] : memref<8x512xf32, #tpu.memory_space<vmem>>, vector<8x512xf32>
      tpu.vector_store %arg5[%c0, %c0_7], %14 {strides = array<i32>} : memref<8x512xf32, #tpu.memory_space<vmem>>, vector<8x512xf32>,
      %cst_8 = arith.constant 0.000000e+00 : f32
      %16 = vector.broadcast %cst_8 : f32 to vector<8x512xf32>
      %c0_9 = arith.constant 0 : index
      %c0_10 = arith.constant 0 : index
      %17 = vector.load %arg6[%c0_9, %c0_10] : memref<8x512xf32, #tpu.memory_space<vmem>>, vector<8x512xf32>
      tpu.vector_store %arg6[%c0_9, %c0_10], %16 {strides = array<i32>} : memref<8x512xf32, #tpu.memory_space<vmem>>, vector<8x512xf32>,
      %cst_11 = arith.constant 0.000000e+00 : f32
      %18 = vector.broadcast %cst_11 : f32 to vector<8x512xf32>
      %c0_12 = arith.constant 0 : index
      %c0_13 = arith.constant 0 : index
      %19 = vector.load %arg7[%c0_12, %c0_13] : memref<8x512xf32, #tpu.memory_space<vmem>>, vector<8x512xf32>
      tpu.vector_store %arg7[%c0_12, %c0_13], %18 {strides = array<i32>} : memref<8x512xf32, #tpu.memory_space<vmem>>, vector<8x512xf32>,
    } else {
    }
    %c0_i32_1 = arith.constant 0 : i32
    %5 = arith.cmpi slt, %1, %c0_i32_1 : i32
    %6 = arith.extui %5 : i1 to i32
    %c0_i32_2 = arith.constant 0 : i32
    %7 = arith.cmpi ne, %6, %c0_i32_2 : i32
    scf.if %7 {
      %c0 = arith.constant 0 : index
      %c0_7 = arith.constant 0 : index
      %14 = vector.load %arg3[%c0, %c0_7] : memref<8x512xf32, #tpu.memory_space<vmem>>, vector<8x512xf32>
      %c0_8 = arith.constant 0 : index
      %c0_9 = arith.constant 0 : index
      %15 = vector.load %arg2[%c0_8, %c0_9] : memref<8x512xf32, #tpu.memory_space<vmem>>, vector<8x512xf32>
      %16 = arith.subf %14, %15 : vector<8x512xf32>
      %c0_10 = arith.constant 0 : index
      %c0_11 = arith.constant 0 : index
      %17 = vector.load %arg5[%c0_10, %c0_11] : memref<8x512xf32, #tpu.memory_space<vmem>>, vector<8x512xf32>
      %18 = vector.shape_cast %14 : vector<8x512xf32> to vector<1x8x512xf32>
      %cst = arith.constant dense<0.000000e+00> : vector<8x512xf32>
      %19 = vector.multi_reduction <add>, %18, %cst [0] : vector<1x8x512xf32> to vector<8x512xf32>
      %20 = arith.addf %17, %19 : vector<8x512xf32>
      %c0_12 = arith.constant 0 : index
      %c0_13 = arith.constant 0 : index
      %21 = vector.load %arg5[%c0_12, %c0_13] : memref<8x512xf32, #tpu.memory_space<vmem>>, vector<8x512xf32>
      tpu.vector_store %arg5[%c0_12, %c0_13], %20 {strides = array<i32>} : memref<8x512xf32, #tpu.memory_space<vmem>>, vector<8x512xf32>,
      %c0_14 = arith.constant 0 : index
      %c0_15 = arith.constant 0 : index
      %22 = vector.load %arg6[%c0_14, %c0_15] : memref<8x512xf32, #tpu.memory_space<vmem>>, vector<8x512xf32>
      %23 = arith.mulf %14, %14 : vector<8x512xf32>
      %24 = vector.shape_cast %23 : vector<8x512xf32> to vector<1x8x512xf32>
      %cst_16 = arith.constant dense<0.000000e+00> : vector<8x512xf32>
      %25 = vector.multi_reduction <add>, %24, %cst_16 [0] : vector<1x8x512xf32> to vector<8x512xf32>
      %26 = arith.addf %22, %25 : vector<8x512xf32>
      %c0_17 = arith.constant 0 : index
      %c0_18 = arith.constant 0 : index
      %27 = vector.load %arg6[%c0_17, %c0_18] : memref<8x512xf32, #tpu.memory_space<vmem>>, vector<8x512xf32>
      tpu.vector_store %arg6[%c0_17, %c0_18], %26 {strides = array<i32>} : memref<8x512xf32, #tpu.memory_space<vmem>>, vector<8x512xf32>,
      %c0_19 = arith.constant 0 : index
      %c0_20 = arith.constant 0 : index
      %28 = vector.load %arg7[%c0_19, %c0_20] : memref<8x512xf32, #tpu.memory_space<vmem>>, vector<8x512xf32>
      %29 = arith.mulf %16, %16 : vector<8x512xf32>
      %30 = vector.shape_cast %29 : vector<8x512xf32> to vector<1x8x512xf32>
      %cst_21 = arith.constant dense<0.000000e+00> : vector<8x512xf32>
      %31 = vector.multi_reduction <add>, %30, %cst_21 [0] : vector<1x8x512xf32> to vector<8x512xf32>
      %32 = arith.addf %28, %31 : vector<8x512xf32>
      %c0_22 = arith.constant 0 : index
      %c0_23 = arith.constant 0 : index
      %33 = vector.load %arg7[%c0_22, %c0_23] : memref<8x512xf32, #tpu.memory_space<vmem>>, vector<8x512xf32>
      tpu.vector_store %arg7[%c0_22, %c0_23], %32 {strides = array<i32>} : memref<8x512xf32, #tpu.memory_space<vmem>>, vector<8x512xf32>,
    } else {
    }
    %c0_i32_3 = arith.constant 0 : i32
    %8 = arith.cmpi eq, %1, %c0_i32_3 : i32
    %9 = arith.extui %8 : i1 to i32
    %c0_i32_4 = arith.constant 0 : i32
    %10 = arith.cmpi ne, %9, %c0_i32_4 : i32
    scf.if %10 {
      %c0 = arith.constant 0 : index
      %c0_7 = arith.constant 0 : index
      %14 = vector.load %arg3[%c0, %c0_7] : memref<8x512xf32, #tpu.memory_space<vmem>>, vector<8x512xf32>
      %c0_8 = arith.constant 0 : index
      %c0_9 = arith.constant 0 : index
      %15 = vector.load %arg2[%c0_8, %c0_9] : memref<8x512xf32, #tpu.memory_space<vmem>>, vector<8x512xf32>
      %16 = tpu.iota {dimensions = array<i32: 0>} : vector<8x512xi32>
      %c4_i32 = arith.constant 4 : i32
      %17 = vector.broadcast %c4_i32 : i32 to vector<8x512xi32>
      %18 = arith.cmpi slt, %16, %17 : vector<8x512xi32>
      %cst = arith.constant 0.000000e+00 : f32
      %19 = vector.broadcast %cst : f32 to vector<8x512xf32>
      %20 = arith.select %18, %14, %19 : vector<8x512xi1>, vector<8x512xf32>
      %cst_10 = arith.constant 0.000000e+00 : f32
      %21 = vector.broadcast %cst_10 : f32 to vector<8x512xf32>
      %22 = arith.select %18, %15, %21 : vector<8x512xi1>, vector<8x512xf32>
      %23 = arith.subf %20, %22 : vector<8x512xf32>
      %c0_11 = arith.constant 0 : index
      %c0_12 = arith.constant 0 : index
      %24 = vector.load %arg5[%c0_11, %c0_12] : memref<8x512xf32, #tpu.memory_space<vmem>>, vector<8x512xf32>
      %25 = vector.shape_cast %20 : vector<8x512xf32> to vector<1x8x512xf32>
      %cst_13 = arith.constant dense<0.000000e+00> : vector<8x512xf32>
      %26 = vector.multi_reduction <add>, %25, %cst_13 [0] : vector<1x8x512xf32> to vector<8x512xf32>
      %27 = arith.addf %24, %26 : vector<8x512xf32>
      %c0_14 = arith.constant 0 : index
      %c0_15 = arith.constant 0 : index
      %28 = vector.load %arg5[%c0_14, %c0_15] : memref<8x512xf32, #tpu.memory_space<vmem>>, vector<8x512xf32>
      tpu.vector_store %arg5[%c0_14, %c0_15], %27 {strides = array<i32>} : memref<8x512xf32, #tpu.memory_space<vmem>>, vector<8x512xf32>,
      %c0_16 = arith.constant 0 : index
      %c0_17 = arith.constant 0 : index
      %29 = vector.load %arg6[%c0_16, %c0_17] : memref<8x512xf32, #tpu.memory_space<vmem>>, vector<8x512xf32>
      %30 = arith.mulf %20, %20 : vector<8x512xf32>
      %31 = vector.shape_cast %30 : vector<8x512xf32> to vector<1x8x512xf32>
      %cst_18 = arith.constant dense<0.000000e+00> : vector<8x512xf32>
      %32 = vector.multi_reduction <add>, %31, %cst_18 [0] : vector<1x8x512xf32> to vector<8x512xf32>
      %33 = arith.addf %29, %32 : vector<8x512xf32>
      %c0_19 = arith.constant 0 : index
      %c0_20 = arith.constant 0 : index
      %34 = vector.load %arg6[%c0_19, %c0_20] : memref<8x512xf32, #tpu.memory_space<vmem>>, vector<8x512xf32>
      tpu.vector_store %arg6[%c0_19, %c0_20], %33 {strides = array<i32>} : memref<8x512xf32, #tpu.memory_space<vmem>>, vector<8x512xf32>,
      %c0_21 = arith.constant 0 : index
      %c0_22 = arith.constant 0 : index
      %35 = vector.load %arg7[%c0_21, %c0_22] : memref<8x512xf32, #tpu.memory_space<vmem>>, vector<8x512xf32>
      %36 = arith.mulf %23, %23 : vector<8x512xf32>
      %37 = vector.shape_cast %36 : vector<8x512xf32> to vector<1x8x512xf32>
      %cst_23 = arith.constant dense<0.000000e+00> : vector<8x512xf32>
      %38 = vector.multi_reduction <add>, %37, %cst_23 [0] : vector<1x8x512xf32> to vector<8x512xf32>
      %39 = arith.addf %35, %38 : vector<8x512xf32>
      %c0_24 = arith.constant 0 : index
      %c0_25 = arith.constant 0 : index
      %40 = vector.load %arg7[%c0_24, %c0_25] : memref<8x512xf32, #tpu.memory_space<vmem>>, vector<8x512xf32>
      tpu.vector_store %arg7[%c0_24, %c0_25], %39 {strides = array<i32>} : memref<8x512xf32, #tpu.memory_space<vmem>>, vector<8x512xf32>,
    } else {
    }
    %c0_i32_5 = arith.constant 0 : i32
    %11 = arith.cmpi eq, %arg1, %c0_i32_5 : i32
    %12 = arith.extui %11 : i1 to i32
    %c0_i32_6 = arith.constant 0 : i32
    %13 = arith.cmpi ne, %12, %c0_i32_6 : i32
    scf.if %13 {
      %c0 = arith.constant 0 : index
      %c0_7 = arith.constant 0 : index
      %14 = vector.load %arg5[%c0, %c0_7] : memref<8x512xf32, #tpu.memory_space<vmem>>, vector<8x512xf32>
      %15 = vector.shape_cast %14 : vector<8x512xf32> to vector<1x8x512xf32>
      %cst = arith.constant dense<0.000000e+00> : vector<1xf32>
      %16 = vector.multi_reduction <add>, %15, %cst [1, 2] : vector<1x8x512xf32> to vector<1xf32>
      %17 = vector.shape_cast %16 : vector<1xf32> to vector<1x1x1xf32>
      %18 = vector.extract %17[0, 0, 0] : f32 from vector<1x1x1xf32>
      %c0_8 = arith.constant 0 : index
      %c0_9 = arith.constant 0 : index
      %19 = vector.load %arg6[%c0_8, %c0_9] : memref<8x512xf32, #tpu.memory_space<vmem>>, vector<8x512xf32>
      %20 = vector.shape_cast %19 : vector<8x512xf32> to vector<1x8x512xf32>
      %cst_10 = arith.constant dense<0.000000e+00> : vector<1xf32>
      %21 = vector.multi_reduction <add>, %20, %cst_10 [1, 2] : vector<1x8x512xf32> to vector<1xf32>
      %22 = vector.shape_cast %21 : vector<1xf32> to vector<1x1x1xf32>
      %23 = vector.extract %22[0, 0, 0] : f32 from vector<1x1x1xf32>
      %c0_11 = arith.constant 0 : index
      %c0_12 = arith.constant 0 : index
      %24 = vector.load %arg7[%c0_11, %c0_12] : memref<8x512xf32, #tpu.memory_space<vmem>>, vector<8x512xf32>
      %25 = vector.shape_cast %24 : vector<8x512xf32> to vector<1x8x512xf32>
      %cst_13 = arith.constant dense<0.000000e+00> : vector<1xf32>
      %26 = vector.multi_reduction <add>, %25, %cst_13 [1, 2] : vector<1x8x512xf32> to vector<1xf32>
      %27 = vector.shape_cast %26 : vector<1xf32> to vector<1x1x1xf32>
      %28 = vector.extract %27[0, 0, 0] : f32 from vector<1x1x1xf32>
      %29 = tpu.iota {dimensions = array<i32: 2>} : vector<1x8x128xi32>
      %c0_i32_14 = arith.constant 0 : i32
      %30 = vector.broadcast %c0_i32_14 : i32 to vector<1x8x128xi32>
      %31 = arith.cmpi eq, %29, %30 : vector<1x8x128xi32>
      %c1_i32_15 = arith.constant 1 : i32
      %32 = vector.broadcast %c1_i32_15 : i32 to vector<1x8x128xi32>
      %33 = arith.cmpi eq, %29, %32 : vector<1x8x128xi32>
      %c2_i32 = arith.constant 2 : i32
      %34 = vector.broadcast %c2_i32 : i32 to vector<1x8x128xi32>
      %35 = arith.cmpi eq, %29, %34 : vector<1x8x128xi32>
      %cst_16 = arith.constant 0.000000e+00 : f32
      %36 = vector.broadcast %28 : f32 to vector<1x8x128xf32>
      %37 = vector.broadcast %cst_16 : f32 to vector<1x8x128xf32>
      %38 = arith.select %35, %36, %37 : vector<1x8x128xi1>, vector<1x8x128xf32>
      %39 = vector.broadcast %23 : f32 to vector<1x8x128xf32>
      %40 = arith.select %33, %39, %38 : vector<1x8x128xi1>, vector<1x8x128xf32>
      %41 = vector.broadcast %18 : f32 to vector<1x8x128xf32>
      %42 = arith.select %31, %41, %40 : vector<1x8x128xi1>, vector<1x8x128xf32>
      %c0_17 = arith.constant 0 : index
      %c0_18 = arith.constant 0 : index
      %c0_19 = arith.constant 0 : index
      %43 = vector.load %arg4[%c0_17, %c0_18, %c0_19] : memref<1x8x128xf32, #tpu.memory_space<vmem>>, vector<1x8x128xf32>
      tpu.vector_store %arg4[%c0_17, %c0_18, %c0_19], %42 {strides = array<i32>} : memref<1x8x128xf32, #tpu.memory_space<vmem>>, vector<1x8x128xf32>,
    } else {
    }
    return
  }
  func.func @transform_0(%arg0: i32, %arg1: i32) -> (i32, i32) {
    %c1_i32 = arith.constant 1 : i32
    %0 = arith.muli %arg0, %c1_i32 : i32
    %1 = arith.addi %0, %arg1 : i32
    %c0_i32 = arith.constant 0 : i32
    %2 = arith.minsi %1, %c0_i32 : i32
    %c0_i32_0 = arith.constant 0 : i32
    %c0_i32_1 = arith.constant 0 : i32
    return %2, %c0_i32_0 : i32, i32
  }
  func.func @transform_1(%arg0: i32, %arg1: i32) -> (i32, i32) {
    %c1_i32 = arith.constant 1 : i32
    %0 = arith.muli %arg0, %c1_i32 : i32
    %1 = arith.addi %0, %arg1 : i32
    %c0_i32 = arith.constant 0 : i32
    %2 = arith.minsi %1, %c0_i32 : i32
    %c0_i32_0 = arith.constant 0 : i32
    %c0_i32_1 = arith.constant 0 : i32
    return %2, %c0_i32_0 : i32, i32
  }
  func.func @transform_2(%arg0: i32, %arg1: i32) -> (i32, i32, i32) {
    %c0_i32 = arith.constant 0 : i32
    %c0_i32_0 = arith.constant 0 : i32
    %c0_i32_1 = arith.constant 0 : i32
    return %arg0, %c0_i32, %c0_i32_0 : i32, i32, i32
  }
}

</mosaic_0001>

<bundles_post_ra>
// kernel: tpu_custom_call.1
= control target key start
LH: loop header
LB: loop body
LE: loop exit
PB: predicated region body
PF: predicated region fallthrough
CT: control target
= control target key end

     0   :  { %7 = vsyncpa [#allocation6], 0  ;;  %s1243_s0 = inlined_call_operand.hbm [shape: f32[4,512], index: 0, kind: input, shape index: {}]   ;;  %s1244_s1 = inlined_call_operand.hbm [shape: f32[4,512], index: 1, kind: input, shape index: {}]   ;;  %s1245_s2 = inlined_call_operand.hbm [shape: f32[2,8,128], index: 2, kind: output, shape index: {}]  }
   0x1   :  { %9 = vsyncpa [#allocation6 + $0x1], 0 }
   0x2   :  { %10 = vsyncpa [#allocation9], 0 }
   0x3   :  { %12 = vsyncpa [#allocation9 + $0x1], 0 }
   0x4   :  { %13 = vsyncpa [#allocation7], 0 }
   0x5   :  { %15 = vsyncpa [#allocation7 + $0x1], 0  ;;  %s1054_s9 = smov 0   ;;  %s1056_s10 = smov 0  }
   0x6   :  { %s1058_s11 = smov 0   ;;  %s1060_s12 = smov 0  }
   0x7   :  { %s1062_s13 = smov 0   ;;  %s1064_s14 = smov 0  }
   0x8   :  { %s1066_s15 = smov 0   ;;  %s1068_s16 = smov 0  }
   0x9 LB: > { %s711_s17 = sadd.s32 4294967295, %s1030_s16   ;;  %s712_s18 = sadd.s32 4294967294, %s1030_s16   ;;  %s1030_s16 = sphi %s1068_s16, %s21_s16   ;;  %s1026_s15 = sphi %s1066_s15, %s1255_s15   ;;  %s1022_s14 = sphi %s1064_s14, %s1254_s14   ;;  %s1018_s13 = sphi %s1062_s13, %s1233_s13   ;;  %s1014_s12 = sphi %s1060_s12, %s1253_s12   ;;  %s1010_s11 = sphi %s1058_s11, %s1252_s11   ;;  %s1006_s10 = sphi %s1056_s10, %s1251_s10   ;;  %s1002_s9 = sphi %s1054_s9, %s1250_s9  }
   0xa   : > { %s33_s19 = sadd.s32 1, %s1026_s15  ;;  %p999_p1 = scmp.ne.s32.totalorder %s1018_s13, 0 }
   0xb   : > { %p35_p0 = scmp.ge.s32.totalorder %s33_s19, 2  ;;  %p54_p2 = scmp.eq.s32.totalorder %s1030_s16, 0 }
   0xc   : > { %p59_p3 = scmp.ne.s32.totalorder %s1018_s13, %s1014_s12  ;;  %p60_p5 = scmp.eq.s32.totalorder %s711_s17, 0 }
   0xd   : > { %s1257_s19 = smov (%p35_p0, %s33_s19), 0  ;;  %p1100_p4 = por %p999_p1, %p54_p2 }
   0xe   : > { %p1104_p6 = por %p60_p5, %p59_p3  ;;  %s101_s22 = ssub.s32 %s1026_s15, %s1257_s19 }
   0xf   : > { %p102_p7 = scmp.eq.s32.totalorder %s101_s22, 0  ;;  %s104_s23 = sadd.s32 1, %s1010_s11 }
  0x10   : > { %p114_p8 = scmp.ne.s32.totalorder %s1010_s11, %s1006_s10  ;;  %p115_p9 = scmp.eq.s32.totalorder %s711_s17, 1 }
  0x11   : > { %s1112_s24 = scalar_select %p102_p7, %s1010_s11, %s104_s23  }
  0x12   : > { %p120_p10 = scmp.ne.s32.totalorder %s1006_s10, %s1002_s9  ;;  %p121_p11 = scmp.eq.s32.totalorder %s712_s18, 1 }
  0x13   : > { %p1118_p12 = por %p115_p9, %p114_p8  ;;  %p714_p0 = scmp.ge.s32.totalorder %s1030_s16, 2 }
  0x14   : > { %p1122_p13 = por %p121_p11, %p120_p10 }
  0x15   : > { %137 = sbr.rel (%p714_p0) target bundleno = 70 (0x46), region = 16 }
  0x1a   : > { %140 = sbr.rel (!%p1100_p4) target bundleno = 48 (0x30), region = 20 }
  0x1f   : > { %155 = vsyncadd [#allocation6], 256  ;;  %s1032_s27 = smov [#allocation5]   ;;  %s161_s3 = sshll.u32 %s1243_s0, 4  ;;  %s162_s3 = int_to_ptr.hbm [resolvable:$true] %s161_s3 }
  0x20   : > { %s163_s28 = sshll.u32 %s1032_s27, 4  ;;  %s841_s4 = sshra.s32 %s162_s3, 4  ;;  %s164_s28 = int_to_ptr.vmem [resolvable:$true] %s163_s28  ;;  %s842_s4 = int_to_ptr.hbm [resolvable:$true] %s841_s4 }
  0x21   : > { %s848_s5 = scalar_lea.hbm %s842_s4, 16  ;;  %s852_s8 = scalar_lea.hbm %s1243_s0, 16 }
  0x22   : > { %p849_p1 = scmp.ne.s32.totalorder %s842_s4, %s848_s5  ;;  %p854_p2 = scmp.lt.s32.totalorder %s852_s8, %s848_s5 }
  0x24   : > { %p856_p3 = pnand %p854_p2, %p849_p1 }
  0x26   : > { %859 = shalt.err (!%p856_p3)
}
  0x27   : > { %s860_s12 = sshra.s32 %s164_s28, 4  ;;  %s871_s18 = scalar_lea.vmem %s1032_s27, 64  ;;  %s861_s12 = int_to_ptr.vmem [resolvable:$true] %s860_s12 }
  0x28   : > { %s867_s17 = scalar_lea.vmem %s861_s12, 16 }
  0x29   : > { %p868_p5 = scmp.ne.s32.totalorder %s861_s12, %s867_s17  ;;  %p873_p7 = scmp.lt.s32.totalorder %s871_s18, %s867_s17 }
  0x2b   : > { %p875_p8 = pnand %p873_p7, %p868_p5 }
  0x2d   : > { %878 = shalt.err (!%p875_p8)
}
  0x2e   : > { %s1033_s22 = smov 256   ;;  %s1034_s23 = smov 16  }
  0x2f   : > { %169 = dma.hbm_to_vmem [thread:$0]  %s162_s3, 256, %s164_s28, [#allocation6], %s1033_s22, %s1033_s22, %s1034_s23  }
  0x30 PF: > { %172 = sbr.rel (!%p1100_p4) target bundleno = 70 (0x46), region = 24 }
  0x35   : > { %187 = vsyncadd [#allocation9], 256  ;;  %s1035_s29 = smov [#allocation8]   ;;  %s193_s6 = sshll.u32 %s1244_s1, 4  ;;  %s194_s6 = int_to_ptr.hbm [resolvable:$true] %s193_s6 }
  0x36   : > { %s195_s30 = sshll.u32 %s1035_s29, 4  ;;  %s880_s27 = sshra.s32 %s194_s6, 4  ;;  %s196_s30 = int_to_ptr.vmem [resolvable:$true] %s195_s30  ;;  %s881_s27 = int_to_ptr.hbm [resolvable:$true] %s880_s27 }
  0x37   : > { %s887_s7 = scalar_lea.hbm %s881_s27, 16  ;;  %s891_s28 = scalar_lea.hbm %s1244_s1, 16 }
  0x38   : > { %p888_p9 = scmp.ne.s32.totalorder %s881_s27, %s887_s7  ;;  %p893_p10 = scmp.lt.s32.totalorder %s891_s28, %s887_s7 }
  0x3a   : > { %p895_p11 = pnand %p893_p10, %p888_p9 }
  0x3c   : > { %898 = shalt.err (!%p895_p11)
}
  0x3d   : > { %s899_s20 = sshra.s32 %s196_s30, 4  ;;  %s910_s17 = scalar_lea.vmem %s1035_s29, 64  ;;  %s900_s20 = int_to_ptr.vmem [resolvable:$true] %s899_s20 }
  0x3e   : > { %s906_s3 = scalar_lea.vmem %s900_s20, 16 }
  0x3f   : > { %p907_p4 = scmp.ne.s32.totalorder %s900_s20, %s906_s3  ;;  %p912_p1 = scmp.lt.s32.totalorder %s910_s17, %s906_s3 }
  0x41   : > { %p914_p2 = pnand %p912_p1, %p907_p4 }
  0x43   : > { %917 = shalt.err (!%p914_p2)
}
  0x44   : > { %s1036_s18 = smov 256   ;;  %s1037_s22 = smov 16  }
  0x45   : > { %201 = dma.hbm_to_vmem [thread:$0]  %s194_s6, 256, %s196_s30, [#allocation9], %s1036_s18, %s1036_s18, %s1037_s22  }
  0x46 PF: > { %p733_p3 = scmp.ge.s32.totalorder %s1030_s16, 1  ;;  %p203_p5 = scmp.lt.s32.totalorder %s1030_s16, 3 }
  0x48   : > { %p204_p7 = pnand %p733_p3, %p203_p5 }
  0x49   : > { %s209_s23 = sand.u32 (!%p204_p7), 1, %s1018_s13  }
  0x4a   : > { %207 = sbr.rel (%p204_p7) target bundleno = 369 (0x171), region = 28  ;;  %s734_s4 = sshll.u32 (!%p204_p7), %s209_s23, 5 }
  0x4b   : > { %s210_s5 = scalar_lea.sflag (!%p204_p7), [#allocation6], %s209_s23  ;;  %s1148_s29 = scalar_lea.vmem (!%p204_p7), [#allocation5], %s734_s4 }
  0x4f   : > { %984 = dma.done.wait (%p1104_p6), %s210_s5, 512  }
  0x50   : > { %986 = vsyncadd (%p1104_p6), %s210_s5, 4294966784  ;;  %s220_s30 = scalar_lea.sflag [#allocation9], %s209_s23  ;;  %s1154_s6 = scalar_lea.vmem [#allocation8], %s734_s4 }
  0x51   : > { %988 = dma.done.wait (%p1104_p6), %s220_s30, 512  }
  0x52   : > { %990 = vsyncadd (%p1104_p6), %s220_s30, 4294966784  ;;  %s247_s27 = sand.u32 1, %s1006_s10   ;;  %v1038_v0 = vmov 0.0   ;;  %p737_p6 = scmp.ge.s32.totalorder %s1022_s14, 0 }
  0x53   : > { %s1163_s7 = sshll.u32 %s247_s27, 3  ;;  %269 = vst [vmem:[#allocation2 + $0x10] sm:$0xff] %v1038_v0 }
  0x54   : > { %270 = vst [vmem:[#allocation2] sm:$0xff] %v1038_v0  ;;  %s249_s21 = scalar_lea.vmem [#allocation10], %s1163_s7 }
  0x55   : > { %271 = vst [vmem:[#allocation2 + $0x18] sm:$0xff] %v1038_v0 }
  0x56   : > { %272 = vst [vmem:[#allocation2 + $0x8] sm:$0xff] %v1038_v0 }
  0x57   : > { %273 = vst [vmem:[#allocation3] sm:$0xff] %v1038_v0 }
  0x58   : > { %274 = vst [vmem:[#allocation3 + $0x18] sm:$0xff] %v1038_v0 }
  0x59   : > { %275 = vst [vmem:[#allocation3 + $0x8] sm:$0xff] %v1038_v0 }
  0x5a   : > { %276 = vst [vmem:[#allocation3 + $0x10] sm:$0xff] %v1038_v0  ;;  %284 = sbr.rel (%p737_p6) target bundleno = 130 (0x82), region = 44 }
  0x5b   : > { %277 = vst [vmem:[#allocation4] sm:$0xff] %v1038_v0 }
  0x5c   : > { %278 = vst [vmem:[#allocation4 + $0x8] sm:$0xff] %v1038_v0 }
  0x5d   : > { %279 = vst [vmem:[#allocation4 + $0x10] sm:$0xff] %v1038_v0 }
  0x5e   : > { %280 = vst [vmem:[#allocation4 + $0x18] sm:$0xff] %v1038_v0 }
  0x5f   : > { %v285_v1 = vld [vmem:[%s1154_s6] sm:$0xff]  ;;  %v287_v2 = vld [vmem:[%s1154_s6 + $0x10] sm:$0xff]  ;;  %v286_v3 = vld [vmem:[%s1154_s6 + $0x8] sm:$0xff] }
  0x60   : > { %309 = vst [vmem:[#allocation1] ss:$2 sm:$0xff] %v285_v1  ;;  %v288_v4 = vld [vmem:[%s1154_s6 + $0x18] sm:$0xff]  ;;  %v336_v5 = vmul.f32 %v285_v1, %v285_v1  ;;  %v289_v6 = vld [vmem:[%s1148_s29] sm:$0xff]  ;;  %v338_v7 = vmul.f32 %v287_v2, %v287_v2  ;;  %v297_v8 = vld [vmem:[#allocation2 + $0x10] sm:$0xff]  ;;  %v337_v12 = vmul.f32 %v286_v3, %v286_v3 }
  0x61   : > { %311 = vst [vmem:[#allocation1 + $0x1] ss:$2 sm:$0xff] %v287_v2  ;;  %v291_v9 = vld [vmem:[%s1148_s29 + $0x10] sm:$0xff]  ;;  %v298_v10 = vld [vmem:[#allocation2] sm:$0xff]  ;;  %v299_v11 = vld [vmem:[#allocation2 + $0x18] sm:$0xff]  ;;  %v339_v15 = vmul.f32 %v288_v4, %v288_v4  ;;  %v293_v18 = vsub.f32 %v285_v1, %v289_v6 }
  0x62   : > { %313 = vst [vmem:[#allocation1 + $0x10] ss:$2 sm:$0xff] %v286_v3  ;;  %v300_v17 = vld [vmem:[#allocation2 + $0x8] sm:$0xff]  ;;  %v295_v22 = vsub.f32 %v287_v2, %v291_v9  ;;  %v292_v23 = vld [vmem:[%s1148_s29 + $0x18] sm:$0xff]  ;;  %v332_v31 = vld [vmem:[#allocation3] sm:$0xff] }
  0x63   : > { %315 = vst [vmem:[#allocation1 + $0x11] ss:$2 sm:$0xff] %v288_v4  ;;  %v290_v19 = vld [vmem:[%s1148_s29 + $0x8] sm:$0xff]  ;;  %v375_v28 = vmul.f32 %v293_v18, %v293_v18  ;;  %v296_v29 = vsub.f32 %v288_v4, %v292_v23  ;;  %v333_v32 = vld [vmem:[#allocation3 + $0x18] sm:$0xff]  ;;  %v335_v39 = vld [vmem:[#allocation3 + $0x10] sm:$0xff] }
  0x64   : > { %v294_v27 = vsub.f32 %v286_v3, %v290_v19  ;;  %v377_v30 = vmul.f32 %v295_v22, %v295_v22  ;;  %v334_v37 = vld [vmem:[#allocation3 + $0x8] sm:$0xff]  ;;  %v371_v45 = vld [vmem:[#allocation4] sm:$0xff]  ;;  %v373_v50 = vld [vmem:[#allocation4 + $0x10] sm:$0xff] }
  0x65   : > { %v378_v36 = vmul.f32 %v296_v29, %v296_v29  ;;  %v372_v46 = vld [vmem:[#allocation4 + $0x8] sm:$0xff]  ;;  %v374_v52 = vld [vmem:[#allocation4 + $0x18] sm:$0xff] }
  0x66   : > { %v376_v33 = vmul.f32 %v294_v27, %v294_v27 }
  0x68   : > { %v316_v13 = vld.sshfl [vmem:[#allocation1] sm:$0xff pattern:$0x75316420]  ;;  %v317_v14 = vld.sshfl [vmem:[#allocation1 + $0x8] sm:$0xff pattern:$0x75316420] }
  0x69   : > { %348 = vst [vmem:[#allocation1] ss:$2 sm:$0xff] %v336_v5  ;;  %v324_v16 = vadd.f32 %v316_v13, %v297_v8  ;;  %v325_v21 = vadd.f32 %v317_v14, %v298_v10 }
  0x6a   : > { %350 = vst [vmem:[#allocation1 + $0x1] ss:$2 sm:$0xff] %v338_v7  ;;  %v318_v20 = vld.sshfl [vmem:[#allocation1 + $0x10] sm:$0xff pattern:$0x75316420] }
  0x6b   : > { %v319_v24 = vld.sshfl [vmem:[#allocation1 + $0x18] sm:$0xff pattern:$0x75316420]  ;;  %328 = vst [vmem:[#allocation2 + $0x10] sm:$0xff] %v324_v16  ;;  %v326_v25 = vadd.f32 %v318_v20, %v299_v11 }
  0x6c   : > { %352 = vst [vmem:[#allocation1 + $0x10] ss:$2 sm:$0xff] %v337_v12  ;;  %v327_v26 = vadd.f32 %v319_v24, %v300_v17 }
  0x6d   : > { %354 = vst [vmem:[#allocation1 + $0x11] ss:$2 sm:$0xff] %v339_v15 }
  0x6e   : > { %329 = vst [vmem:[#allocation2] sm:$0xff] %v325_v21 }
  0x6f   : > { %330 = vst [vmem:[#allocation2 + $0x18] sm:$0xff] %v326_v25 }
  0x70   : > { %331 = vst [vmem:[#allocation2 + $0x8] sm:$0xff] %v327_v26 }
  0x71   : > { %v355_v34 = vld.sshfl [vmem:[#allocation1] sm:$0xff pattern:$0x75316420]  ;;  %v356_v35 = vld.sshfl [vmem:[#allocation1 + $0x8] sm:$0xff pattern:$0x75316420] }
  0x72   : > { %387 = vst [vmem:[#allocation1] ss:$2 sm:$0xff] %v375_v28  ;;  %v363_v38 = vadd.f32 %v355_v34, %v332_v31  ;;  %v364_v42 = vadd.f32 %v356_v35, %v333_v32 }
  0x73   : > { %389 = vst [vmem:[#allocation1 + $0x1] ss:$2 sm:$0xff] %v377_v30 }
  0x74   : > { %v357_v40 = vld.sshfl [vmem:[#allocation1 + $0x10] sm:$0xff pattern:$0x75316420]  ;;  %v358_v41 = vld.sshfl [vmem:[#allocation1 + $0x18] sm:$0xff pattern:$0x75316420] }
  0x75   : > { %391 = vst [vmem:[#allocation1 + $0x10] ss:$2 sm:$0xff] %v376_v33  ;;  %v365_v43 = vadd.f32 %v357_v40, %v334_v37  ;;  %v366_v44 = vadd.f32 %v358_v41, %v335_v39 }
  0x76   : > { %393 = vst [vmem:[#allocation1 + $0x11] ss:$2 sm:$0xff] %v378_v36 }
  0x77   : > { %367 = vst [vmem:[#allocation3] sm:$0xff] %v363_v38 }
  0x78   : > { %368 = vst [vmem:[#allocation3 + $0x18] sm:$0xff] %v364_v42 }
  0x79   : > { %369 = vst [vmem:[#allocation3 + $0x8] sm:$0xff] %v365_v43 }
  0x7a   : > { %370 = vst [vmem:[#allocation3 + $0x10] sm:$0xff] %v366_v44  ;;  %v394_v47 = vld.sshfl [vmem:[#allocation1] sm:$0xff pattern:$0x75316420] }
  0x7b   : > { %v402_v48 = vadd.f32 %v394_v47, %v371_v45  ;;  %v395_v49 = vld.sshfl [vmem:[#allocation1 + $0x8] sm:$0xff pattern:$0x75316420] }
  0x7c   : > { %v403_v51 = vadd.f32 %v395_v49, %v372_v46 }
  0x7d   : > { %406 = vst [vmem:[#allocation4] sm:$0xff] %v402_v48  ;;  %v396_v53 = vld.sshfl [vmem:[#allocation1 + $0x10] sm:$0xff pattern:$0x75316420] }
  0x7e   : > { %407 = vst [vmem:[#allocation4 + $0x8] sm:$0xff] %v403_v51  ;;  %v404_v54 = vadd.f32 %v396_v53, %v373_v50  ;;  %v397_v55 = vld.sshfl [vmem:[#allocation1 + $0x18] sm:$0xff pattern:$0x75316420] }
  0x7f   : > { %v405_v56 = vadd.f32 %v397_v55, %v374_v52 }
  0x80   : > { %408 = vst [vmem:[#allocation4 + $0x10] sm:$0xff] %v404_v54 }
  0x81   : > { %409 = vst [vmem:[#allocation4 + $0x18] sm:$0xff] %v405_v56 }
  0x82 PF: > { %p738_p8 = scmp.ne.s32.totalorder %s1022_s14, 0 }
  0x84   : > { %413 = sbr.rel (%p738_p8) target bundleno = 168 (0xa8), region = 48 }
  0x89   : > { %v414_v57 = vld [vmem:[%s1154_s6] sm:$0xff]  ;;  %v416_v58 = vld [vmem:[%s1154_s6 + $0x10] sm:$0xff]  ;;  %v415_v59 = vld [vmem:[%s1154_s6 + $0x8] sm:$0xff]  ;;  %v422_v60 = vlaneseq }
  0x8a   : > { %429 = vst [vmem:[#allocation1] ss:$2 sm:$0xff] %v414_v57  ;;  %v417_v61 = vld [vmem:[%s1154_s6 + $0x18] sm:$0xff]  ;;  %v418_v63 = vld [vmem:[%s1148_s29] sm:$0xff]  ;;  %v420_v0 = vld [vmem:[%s1148_s29 + $0x10] sm:$0xff] }
  0x8b   : > { %431 = vst [vmem:[#allocation1 + $0x1] ss:$2 sm:$0xff] %v416_v58  ;;  %v423_v62 = vshrl.u32 %v422_v60, 7  ;;  %v419_v1 = vld [vmem:[%s1148_s29 + $0x8] sm:$0xff]  ;;  %v475_v2 = vld [vmem:[#allocation2 + $0x10] sm:$0xff]  ;;  %v476_v3 = vld [vmem:[#allocation2] sm:$0xff] }
  0x8c   : > { %433 = vst [vmem:[#allocation1 + $0x10] ss:$2 sm:$0xff] %v415_v59  ;;  %v421_v6 = vld [vmem:[%s1148_s29 + $0x18] sm:$0xff]  ;;  %v478_v12 = vld [vmem:[#allocation2 + $0x8] sm:$0xff]  ;;  %v491_v17 = vld [vmem:[#allocation3] sm:$0xff] }
  0x8d   : > { %435 = vst [vmem:[#allocation1 + $0x11] ss:$2 sm:$0xff] %v417_v61  ;;  %vm424_vm0 = vcmp.lt.s32.totalorder %v423_v62, 4  ;;  %v477_v9 = vld [vmem:[#allocation2 + $0x18] sm:$0xff]  ;;  %v493_v23 = vld [vmem:[#allocation3 + $0x8] sm:$0xff]  ;;  %v494_v27 = vld [vmem:[#allocation3 + $0x10] sm:$0xff] }
  0x8e   : > { %v492_v21 = vld [vmem:[#allocation3 + $0x18] sm:$0xff]  ;;  %v511_v36 = vld [vmem:[#allocation4] sm:$0xff]  ;;  %v512_v40 = vld [vmem:[#allocation4 + $0x8] sm:$0xff] }
  0x8f   : > { %v513_v47 = vld [vmem:[#allocation4 + $0x10] sm:$0xff]  ;;  %v514_v51 = vld [vmem:[#allocation4 + $0x18] sm:$0xff] }
  0x92   : > { %v436_v4 = vld.sshfl [vmem:[#allocation1] sm:$0xff pattern:$0x75316420]  ;;  %v437_v5 = vld.sshfl [vmem:[#allocation1 + $0x8] sm:$0xff pattern:$0x75316420] }
  0x93   : > { %452 = vst [vmem:[#allocation1] ss:$2 sm:$0xff] %v418_v63  ;;  %v444_v7 = vsel %vm424_vm0, %v436_v4, 0.0  ;;  %v445_v8 = vsel %vm424_vm0, %v437_v5, 0.0 }
  0x94   : > { %454 = vst [vmem:[#allocation1 + $0x1] ss:$2 sm:$0xff] %v420_v0  ;;  %v438_v10 = vld.sshfl [vmem:[#allocation1 + $0x10] sm:$0xff pattern:$0x75316420]  ;;  %v483_v11 = vadd.f32 %v475_v2, %v444_v7  ;;  %v495_v13 = vmul.f32 %v444_v7, %v444_v7  ;;  %v484_v15 = vadd.f32 %v476_v3, %v445_v8  ;;  %v496_v18 = vmul.f32 %v445_v8, %v445_v8 }
  0x95   : > { %v439_v14 = vld.sshfl [vmem:[#allocation1 + $0x18] sm:$0xff pattern:$0x75316420]  ;;  %v446_v16 = vsel %vm424_vm0, %v438_v10, 0.0 }
  0x96   : > { %456 = vst [vmem:[#allocation1 + $0x10] ss:$2 sm:$0xff] %v419_v1  ;;  %v485_v19 = vadd.f32 %v477_v9, %v446_v16  ;;  %v447_v20 = vsel %vm424_vm0, %v439_v14, 0.0  ;;  %v497_v24 = vmul.f32 %v446_v16, %v446_v16  ;;  %v503_v26 = vadd.f32 %v495_v13, %v491_v17 }
  0x97   : > { %458 = vst [vmem:[#allocation1 + $0x11] ss:$2 sm:$0xff] %v421_v6  ;;  %v486_v22 = vadd.f32 %v478_v12, %v447_v20  ;;  %v498_v25 = vmul.f32 %v447_v20, %v447_v20  ;;  %v504_v28 = vadd.f32 %v496_v18, %v492_v21 }
  0x98   : > { %487 = vst [vmem:[#allocation2 + $0x10] sm:$0xff] %v483_v11  ;;  %v505_v29 = vadd.f32 %v497_v24, %v493_v23 }
  0x99   : > { %488 = vst [vmem:[#allocation2] sm:$0xff] %v484_v15  ;;  %v506_v30 = vadd.f32 %v498_v25, %v494_v27 }
  0x9a   : > { %489 = vst [vmem:[#allocation2 + $0x18] sm:$0xff] %v485_v19 }
  0x9b   : > { %490 = vst [vmem:[#allocation2 + $0x8] sm:$0xff] %v486_v22  ;;  %v459_v31 = vld.sshfl [vmem:[#allocation1] sm:$0xff pattern:$0x75316420] }
  0x9c   : > { %507 = vst [vmem:[#allocation3] sm:$0xff] %v503_v26  ;;  %v467_v32 = vsel %vm424_vm0, %v459_v31, 0.0  ;;  %v460_v33 = vld.sshfl [vmem:[#allocation1 + $0x8] sm:$0xff pattern:$0x75316420] }
  0x9d   : > { %508 = vst [vmem:[#allocation3 + $0x18] sm:$0xff] %v504_v28  ;;  %v471_v34 = vsub.f32 %v444_v7, %v467_v32  ;;  %v468_v35 = vsel %vm424_vm0, %v460_v33, 0.0 }
  0x9e   : > { %509 = vst [vmem:[#allocation3 + $0x8] sm:$0xff] %v505_v29  ;;  %v472_v37 = vsub.f32 %v445_v8, %v468_v35  ;;  %v461_v38 = vld.sshfl [vmem:[#allocation1 + $0x10] sm:$0xff pattern:$0x75316420] }
  0x9f   : > { %510 = vst [vmem:[#allocation3 + $0x10] sm:$0xff] %v506_v30  ;;  %v515_v39 = vmul.f32 %v471_v34, %v471_v34  ;;  %v469_v41 = vsel %vm424_vm0, %v461_v38, 0.0  ;;  %v462_v42 = vld.sshfl [vmem:[#allocation1 + $0x18] sm:$0xff pattern:$0x75316420] }
  0xa0   : > { %v516_v43 = vmul.f32 %v472_v37, %v472_v37  ;;  %v473_v44 = vsub.f32 %v446_v16, %v469_v41  ;;  %v470_v45 = vsel %vm424_vm0, %v462_v42, 0.0 }
  0xa1   : > { %v523_v46 = vadd.f32 %v515_v39, %v511_v36  ;;  %v474_v48 = vsub.f32 %v447_v20, %v470_v45 }
  0xa2   : > { %v524_v49 = vadd.f32 %v516_v43, %v512_v40  ;;  %v517_v50 = vmul.f32 %v473_v44, %v473_v44 }
  0xa3   : > { %527 = vst [vmem:[#allocation4] sm:$0xff] %v523_v46  ;;  %v518_v52 = vmul.f32 %v474_v48, %v474_v48 }
  0xa4   : > { %528 = vst [vmem:[#allocation4 + $0x8] sm:$0xff] %v524_v49  ;;  %v525_v53 = vadd.f32 %v517_v50, %v513_v47 }
  0xa5   : > { %v526_v54 = vadd.f32 %v518_v52, %v514_v51 }
  0xa6   : > { %529 = vst [vmem:[#allocation4 + $0x10] sm:$0xff] %v525_v53 }
  0xa7   : > { %530 = vst [vmem:[#allocation4 + $0x18] sm:$0xff] %v526_v54 }
  0xa8 PF: > { %v534_v55 = vld [vmem:[#allocation2 + $0x10] sm:$0xff]  ;;  %v535_v56 = vld [vmem:[#allocation2] sm:$0xff]  ;;  %v536_v57 = vld [vmem:[#allocation2 + $0x18] sm:$0xff]  ;;  %v582_v33 = vlaneseq  ;;  %s740_s8 = sshll.u32 %s1022_s14, 3  ;;  %s1198_s18 = sshll.u32 %s249_s21, 4  ;;  %s608_s18 = int_to_ptr.vmem [resolvable:$true] %s1198_s18 }
  0xa9   : > { %v538_v58 = vadd.f32 %v535_v56, %v534_v55  ;;  %v537_v61 = vld [vmem:[#allocation2 + $0x8] sm:$0xff]  ;;  %v550_v0 = vld [vmem:[#allocation3] sm:$0xff]  ;;  %v551_v3 = vld [vmem:[#allocation3 + $0x18] sm:$0xff]  ;;  %s605_s20 = scalar_lea.hbm %s1245_s2, %s740_s8  ;;  %s595_s14 = scalar_lea.sflag [#allocation7], %s247_s27 }
  0xaa   : > { %v566_v59 = vld [vmem:[#allocation4] sm:$0xff]  ;;  %v552_v5 = vld [vmem:[#allocation3 + $0x8] sm:$0xff]  ;;  %v554_v6 = vadd.f32 %v551_v3, %v550_v0  ;;  %v553_v10 = vld [vmem:[#allocation3 + $0x10] sm:$0xff]  ;;  %v583_v34 = vand.u32 127, %v582_v33  ;;  %s609_s23 = sshll.u32 %s605_s20, 4  ;;  %s939_s6 = scalar_lea.hbm %s1245_s2, 16  ;;  %s610_s23 = int_to_ptr.hbm [resolvable:$true] %s609_s23 }
  0xab   : > { %v567_v60 = vld [vmem:[#allocation4 + $0x8] sm:$0xff]  ;;  %v539_v1 = vadd.f32 %v538_v58, %v536_v57  ;;  %s933_s4 = sshra.s32 %s610_s23, 4  ;;  %s934_s4 = int_to_ptr.hbm [resolvable:$true] %s933_s4 }
  0xac   : > { %v570_v63 = vadd.f32 %v567_v60, %v566_v59  ;;  %v555_v9 = vadd.f32 %v554_v6, %v552_v5  ;;  %vm586_vm1 = vcmp.eq.s32.totalorder %v583_v34, 2  ;;  %vm585_vm2 = vcmp.eq.s32.totalorder %v583_v34, 1  ;;  %s935_s5 = scalar_lea.hbm %s934_s4, 8  ;;  %p940_p4 = scmp.lt.s32.totalorder %s934_s4, %s1245_s2 }
  0xad   : > { %v568_v62 = vld [vmem:[#allocation4 + $0x10] sm:$0xff]  ;;  %v540_v7 = vadd.f32 %v539_v1, %v537_v61  ;;  %vm584_vm3 = vcmp.eq.s32.totalorder %v583_v34, 0  ;;  %p936_p9 = scmp.ne.s32.totalorder %s934_s4, %s935_s5  ;;  %p941_p1 = scmp.lt.s32.totalorder %s939_s6, %s935_s5 }
  0xae   : > { %v569_v2 = vld [vmem:[#allocation4 + $0x18] sm:$0xff]  ;;  %v571_v4 = vadd.f32 %v570_v63, %v568_v62  ;;  %v556_v11 = vadd.f32 %v555_v9, %v553_v10 }
  0xaf   : > { %541 = vadd.xlane.f32.xlu0 %v540_v7  ;;  %p937_p10 = pnand %p936_p9, %p1118_p12  ;;  %p942_p2 = por %p941_p1, %p940_p4 }
  0xb0   : > { %v572_v8 = vadd.f32 %v571_v4, %v569_v2 }
  0xb1   : > { %p938_p11 = pneg %p937_p10 }
  0xb2   : > { %573 = vadd.xlane.f32.xlu1 %v572_v8 }
  0xb3   : > { %p943_p3 = pnand %p942_p2, %p938_p11 }
  0xb7   : > { %557 = vadd.xlane.f32.xlu0 %v556_v11 }
 0x122   : > { %v542_v12 = vpop.xlane.xlu0 %541 }
 0x123   : > { %v543_v13 = vrot.slane %v542_v12, 4 }
 0x125   : > { %v574_v14 = vpop.xlane.xlu1 %573  ;;  %v544_v16 = vadd.f32 %v543_v13, %v542_v12 }
 0x126   : > { %v575_v15 = vrot.slane %v574_v14, 4 }
 0x127   : > { %v545_v18 = vrot.slane %v544_v16, 2 }
 0x128   : > { %v576_v17 = vadd.f32 %v575_v15, %v574_v14 }
 0x129   : > { %v546_v19 = vadd.f32 %v545_v18, %v544_v16 }
 0x12a   : > { %v577_v20 = vrot.slane %v576_v17, 2  ;;  %v558_v21 = vpop.xlane.xlu0 %557 }
 0x12b   : > { %v559_v22 = vrot.slane %v558_v21, 4  ;;  %v547_v23 = vrot.slane %v546_v19, 1 }
 0x12c   : > { %v578_v26 = vadd.f32 %v577_v20, %v576_v17 }
 0x12d   : > { %v560_v24 = vadd.f32 %v559_v22, %v558_v21  ;;  %v548_v25 = vadd.f32 %v547_v23, %v546_v19 }
 0x12e   : > { %v579_v29 = vrot.slane %v578_v26, 1 }
 0x12f   : > { %v561_v27 = vrot.slane %v560_v24, 2  ;;  %749 = vpush %v548_v25 }
 0x130   : > { %v580_v32 = vadd.f32 %v579_v29, %v578_v26 }
 0x131   : > { %v562_v28 = vadd.f32 %v561_v27, %v560_v24 }
 0x133   : > { %v563_v30 = vrot.slane %v562_v28, 1 }
 0x135   : > { %v564_v31 = vadd.f32 %v563_v30, %v562_v28 }
 0x137   : > { %751 = vpush %v564_v31 }
 0x138   : > { %753 = vpush %v580_v32 }
 0x160   : > { %s750_s3 = spop %749 }
 0x161   : > { %v591_v38 = vstv %s750_s3 }
 0x168   : > { %s752_s17 = spop %751 }
 0x169   : > { %v589_v35 = vstv %s752_s17  ;;  %s754_s22 = spop %753 }
 0x16a   : > { %v587_v36 = vstv %s754_s22 }
 0x16b   : > { %v588_v37 = vsel %vm586_vm1, %v587_v36, 0.0 }
 0x16c   : > { %v590_v39 = vsel %vm585_vm2, %v589_v35, %v588_v37 }
 0x16d   : > { %v592_v40 = vsel %vm584_vm3, %v591_v38, %v590_v39 }
 0x16e   : > { %593 = vst [vmem:[%s249_s21] sm:$0xff] %v592_v40 }
 0x16f   : > { %946 = shalt.err (!%p943_p3)
}
 0x170   : > { %757 = dma.vmem_to_hbm [thread:$0]  (%p1118_p12), %s608_s18, 128, %s610_s23, %s595_s14  }
 0x171 PF: > { %s621_s27 = sand.u32 1, %s1002_s9   ;;  %p760_p5 = pnand %p714_p0, %p1122_p13 }
 0x172   : > { %s622_s7 = scalar_lea.sflag [#allocation7], %s621_s27 }
 0x173   : > { %p761_p7 = pneg %p760_p5 }
 0x175   : > { %992 = dma.done.wait (%p761_p7), %s622_s7, 128  }
 0x176   : > { %994 = vsyncadd (%p761_p7), %s622_s7, 4294967168  ;;  %s21_s16 = sadd.s32 1, %s1030_s16   ;;  %s1250_s9 = smov %s1006_s10 }
 0x177   : > { %p18_p6 = scmp.ge.s32.totalorder %s21_s16, 4   ;;  %s1251_s10 = smov %s1010_s11 }
 0x178   : > { %s1252_s11 = smov %s1112_s24  ;;  %s1253_s12 = smov %s1018_s13 }
 0x179   : > { %s1233_s13 = smov 0   ;;  %s1254_s14 = smov %s1026_s15 }
 0x17a   : > { %s1255_s15 = smov %s1257_s19  ;;  %20 = sbr.rel (!%p18_p6) target bundleno = 9 (0x9), region = 117 }
 0x17f   :  { %628 = vsyncpa [#allocation6], 1 }
 0x180   :  { %630 = vsyncpa [#allocation6 + $0x1], 1 }
 0x181   :  { %631 = vsyncpa [#allocation9], 1 }
 0x182   :  { %633 = vsyncpa [#allocation9 + $0x1], 1 }
 0x183   :  { %634 = vsyncpa [#allocation7], 1 }
 0x184   :  { %636 = vsyncpa [#allocation7 + $0x1], 1 }

</bundles_post_ra>
